<compile_context>
chip_gen: v7x
topology: tpu7x:2x2x1
jax: 0.10.0
libtpu: 0.0.40
codegen_flags: <defaults>
</compile_context>

<pallas_src>
import math
import functools

import numpy as np
import jax
import jax.numpy as jnp
from jax.experimental import pallas as pl
from jax.experimental.pallas import tpu as pltpu


LANE = 128
SUBLANE = 8
VMEM_BUDGET_BYTES = 12 * 1024 * 1024   # headroom under smallest default scoped VMEM (v5e: 16 MiB)


def _round_up(x, m):
    return ((x + m - 1) // m) * m


def _cdiv(a, b):
    return -(-a // b)


def _next_pow2(x):
    return 1 << max(0, (int(x) - 1).bit_length())


# ---------------------------------------------------------------------------
# Fused Pallas kernel:
#   encoder MLP over BB*Lp rows -> block-diag masked-mean pool (MXU)
#   -> combined MLP -> tanh * margin
# ---------------------------------------------------------------------------
def _fused_forward_kernel(*refs, n_enc, n_comb, margin):
    # refs = (x_ref, pool_ref, w0, b0, w1, b1, ..., o_ref)
    x_ref, pool_ref = refs[0], refs[1]
    o_ref = refs[-1]
    params = refs[2:-1]

    h = x_ref[...]                                          # (BB*Lp, Din_pad) f32
    idx = 0

    # --- encoder MLP (rowwise over all BB*Lp set elements), ReLU except last ---
    for li in range(n_enc):
        w = params[idx][...]                                # (in_pad, out_pad)
        b = params[idx + 1][...]                            # (1, out_pad)
        idx += 2
        h = jnp.dot(h, w, preferred_element_type=jnp.float32) + b
        if li < n_enc - 1:
            h = jnp.maximum(h, 0.0)

    # --- masked mean pool: block-diagonal pooling matrix with 1/(len+1e-6)
    #     baked in on the host -> one MXU matmul, no XLU reduce, no divide ---
    h = jnp.dot(pool_ref[...], h, preferred_element_type=jnp.float32)   # (BB, NHP)

    # --- combined MLP, ReLU on all but last layer ---
    for li in range(n_comb):
        w = params[idx][...]
        b = params[idx + 1][...]
        idx += 2
        h = jnp.dot(h, w, preferred_element_type=jnp.float32) + b
        if li < n_comb - 1:
            h = jnp.maximum(h, 0.0)

    # --- tanh * margin ---
    o_ref[...] = (jnp.tanh(h) * margin).astype(o_ref.dtype)


@functools.lru_cache(maxsize=64)
def _build_fused_call(nblk, bb, lp, din_pad, out_pad, param_shapes,
                      n_enc, n_comb, margin):
    kernel = functools.partial(_fused_forward_kernel,
                               n_enc=n_enc, n_comb=n_comb, margin=margin)

    in_specs = [
        # BB sets flattened to BB*Lp rows, lane-dense Din_pad (multiple of 128)
        pl.BlockSpec((bb * lp, din_pad), lambda g: (g, 0)),
        # block-diagonal pooling matrix for this batch block (leading dim squeezed)
        pl.BlockSpec((None, bb, bb * lp), lambda g: (g, 0, 0)),
    ]
    # Weights / biases: full arrays with constant block index -> VMEM-resident,
    # Pallas skips re-DMA across grid steps.
    # TODO(synk): pipeline_mode=pl.Buffered(1) would halve their VMEM footprint;
    # skipped (weights are only ~0.5 MiB here) to keep lowering maximally portable.
    for shp in param_shapes:
        in_specs.append(pl.BlockSpec(shp, lambda g: (0, 0)))

    out_specs = pl.BlockSpec((bb, out_pad), lambda g: (g, 0))

    return pl.pallas_call(
        kernel,
        out_shape=jax.ShapeDtypeStruct((nblk * bb, out_pad), jnp.float32),
        grid=(nblk,),
        in_specs=in_specs,
        out_specs=out_specs,
        compiler_params=pltpu.CompilerParams(
            dimension_semantics=("parallel",)),
    )


def fused_forward(data, pool, enc_params_pad, comb_params_pad, margin):
    """data: (B_pad*Lp, Din_pad) f32; pool: (nblk, BB, BB*Lp) f32 -> (B_pad, OUT_pad)."""
    nblk, bb, bl = pool.shape
    lp = bl // bb
    din_pad = data.shape[1]
    out_pad = comb_params_pad[-1][0].shape[1]

    flat_params = []
    for (w, b) in list(enc_params_pad) + list(comb_params_pad):
        flat_params += [w, b]

    call = _build_fused_call(
        int(nblk), int(bb), int(lp), int(din_pad), int(out_pad),
        tuple(tuple(int(d) for d in p.shape) for p in flat_params),
        len(enc_params_pad), len(comb_params_pad), float(margin))
    return call(data, pool, *flat_params)


# ---------------------------------------------------------------------------
# Parameter construction (deterministic, PyTorch-Linear-style init)
# ---------------------------------------------------------------------------
def init_mlp_params(key, ninput, nh, noutput, nlayers):
    if nlayers == 1:
        dims = [ninput, noutput]
    else:
        dims = [ninput] + [nh] * (nlayers - 1) + [noutput]
    params = []
    for i in range(len(dims) - 1):
        key, kw, kb = jax.random.split(key, 3)
        fan_in = dims[i]
        bound = 1.0 / math.sqrt(fan_in)
        w = jax.random.uniform(kw, (dims[i], dims[i + 1]), jnp.float32, -bound, bound)
        b = jax.random.uniform(kb, (dims[i + 1],), jnp.float32, -bound, bound)
        params.append((w, b))
    return params, key


def pad_linear(w, b):
    """Zero-pad a (Din, Dout) weight / (Dout,) bias to lane-dense multiples of 128."""
    din, dout = w.shape
    din_p = _round_up(din, LANE)
    dout_p = _round_up(dout, LANE)
    wp = jnp.zeros((din_p, dout_p), jnp.float32).at[:din, :dout].set(w)
    bp = jnp.zeros((1, dout_p), jnp.float32).at[0, :dout].set(b)
    return wp, bp


# ---------------------------------------------------------------------------
# Host-side ragged-set packing (numpy, single device transfer per array)
# ---------------------------------------------------------------------------
def pack_sets(fvs, din, din_pad, lp, bb, nblk):
    """Returns:
         data: (nblk*bb*lp, din_pad) f32 -- padded set rows, flattened
         pool: (nblk, bb, bb*lp)    f32 -- block-diagonal masked-mean matrix
                                           with 1/(len+1e-6) baked in
    """
    b_pad = nblk * bb
    data = np.zeros((b_pad * lp, din_pad), np.float32)
    pool = np.zeros((nblk, bb, bb * lp), np.float32)
    for i, x in enumerate(fvs):
        xi = np.asarray(x, dtype=np.float32)
        l = xi.shape[0]
        data[i * lp:i * lp + l, :din] = xi
        g, r = divmod(i, bb)
        pool[g, r, r * lp:r * lp + l] = 1.0 / (l + 1e-6)
    return jnp.asarray(data), jnp.asarray(pool)


# ---------------------------------------------------------------------------
# Full model (host glue + one fused, batch-blocked Pallas kernel)
# ---------------------------------------------------------------------------
class NewModel:
    def __init__(self, nh, nh2, nlayers, nlayers2, margin=8, bins=100, seed=0):
        self.margin = float(margin)
        self.ninput = bins * 6
        self.ninput_pad = _round_up(self.ninput, LANE)
        self.nout = 2
        key = jax.random.PRNGKey(seed)
        self.enc_params, key = init_mlp_params(key, self.ninput, nh, nh, nlayers)
        self.comb_params, key = init_mlp_params(key, nh, nh2, 2, nlayers2)
        # Lane-dense zero-padded copies for the fused kernel (numerics unchanged).
        self.enc_params_pad = [pad_linear(w, b) for (w, b) in self.enc_params]
        self.comb_params_pad = [pad_linear(w, b) for (w, b) in self.comb_params]
        self.nhp = self.enc_params_pad[-1][0].shape[1]
        self.out_pad = self.comb_params_pad[-1][0].shape[1]
        self._weight_bytes = int(sum(int(np.prod(w.shape)) * 4 + int(np.prod(b.shape)) * 4
                                     for (w, b) in self.enc_params_pad + self.comb_params_pad))
        # TODO(synk): self.w / self.b / MLP.bn (LayerNorm) exist in the PyTorch
        # __init__ but are unused in forward, so they are not materialized.

    def _choose_tiling(self, batch, maxl):
        # Bucket shapes so they do not trigger a fresh compile on every call:
        #   Lp -> power of two (>= sublane 8), grid length -> power of two.
        lp = max(SUBLANE, _next_pow2(maxl))

        # Batch-block: target >= ~512 rows per grid step so the MXU M dim and
        # per-step DMAs are well filled; BB must be a sublane (8) multiple.
        target_rows = 512
        bb = max(SUBLANE, _round_up(_cdiv(target_rows, lp), SUBLANE))
        bb = min(bb, _round_up(batch, SUBLANE))

        # Explicit VMEM budget (double-buffered blocks + weights + live activations),
        # sized for the smallest default scoped limit across v5e/v6e/v7x.
        def vmem_bytes(bbv):
            rows = bbv * lp
            data_buf = 2 * rows * self.ninput_pad * 4
            pool_buf = 2 * bbv * rows * 4
            out_buf = 2 * bbv * self.out_pad * 4
            act = 2 * rows * max(self.ninput_pad, self.nhp) * 4
            return data_buf + pool_buf + out_buf + act + self._weight_bytes

        while bb > SUBLANE and vmem_bytes(bb) > VMEM_BUDGET_BYTES:
            bb = max(SUBLANE, (bb // 2) // SUBLANE * SUBLANE)

        # Keep >= 2 grid steps when the batch allows it so v7x's two TensorCores
        # both get work ("parallel" axis; no-op on single-core v5e/v6e).
        if batch >= 2 * SUBLANE:
            while bb > SUBLANE and _cdiv(batch, bb) < 2:
                bb = max(SUBLANE, (bb // 2) // SUBLANE * SUBLANE)

        nblk = _next_pow2(_cdiv(batch, bb))
        return lp, bb, nblk

    def forward(self, data_batch):
        fvs = data_batch["fvs_eig"]
        batch = len(fvs)
        maxl = max(int(x.shape[0]) for x in fvs)
        lp, bb, nblk = self._choose_tiling(batch, maxl)
        # TODO(synk): host-side numpy packing + device transfer still sits on the
        # critical path; production use should pre-pack asynchronously / on device.
        data, pool = pack_sets(fvs, self.ninput, self.ninput_pad, lp, bb, nblk)
        out = fused_forward(data, pool, self.enc_params_pad,
                            self.comb_params_pad, self.margin)
        return out[:batch, :self.nout]


# ---------------------------------------------------------------------------
# Pure-JAX reference (for correctness check)
# ---------------------------------------------------------------------------
def reference_forward(model, fvs):
    maxl = max(int(x.shape[0]) for x in fvs)
    batch = len(fvs)
    data = np.zeros((batch, maxl, model.ninput), np.float32)
    mask = np.zeros((batch, maxl, 1), np.float32)
    for i, x in enumerate(fvs):
        xi = np.asarray(x, dtype=np.float32)
        l = xi.shape[0]
        data[i, :l, :] = xi
        mask[i, :l] = 1.0
    data = jnp.asarray(data)
    mask = jnp.asarray(mask)
    h = data.reshape(batch * maxl, model.ninput)
    for i, (w, b) in enumerate(model.enc_params):
        h = h @ w + b
        if i < len(model.enc_params) - 1:
            h = jnp.maximum(h, 0.0)
    h = h.reshape(batch, maxl, -1)
    h = (h * mask).sum(1) / (mask.sum(1) + 1e-6)
    for i, (w, b) in enumerate(model.comb_params):
        h = h @ w + b
        if i < len(model.comb_params) - 1:
            h = jnp.maximum(h, 0.0)
    return jnp.tanh(h) * model.margin


# ---------------------------------------------------------------------------
if __name__ == "__main__":
    # Small config consistent with the module: bins*6 = 600 input features.
    nh, nh2, nlayers, nlayers2, margin = 32, 32, 2, 2, 8
    model = NewModel(nh=nh, nh2=nh2, nlayers=nlayers, nlayers2=nlayers2,
                     margin=margin, bins=100, seed=0)

    key = jax.random.PRNGKey(0)
    k1, k2 = jax.random.split(key)
    # Ragged "set" inputs: batch of 2 point-sets with 5 and 8 elements.
    fvs_eig = [
        jax.random.normal(k1, (5, model.ninput), jnp.float32),
        jax.random.normal(k2, (8, model.ninput), jnp.float32),
    ]
    data_batch = {"fvs_eig": fvs_eig}

    out = model.forward(data_batch)
    out = jax.block_until_ready(out)

    ref = reference_forward(model, fvs_eig)
    assert out.shape == (2, 2), out.shape
    assert jnp.allclose(out, ref, atol=1e-4, rtol=1e-4), (out, ref)

    print("KERNEL_OK")
</pallas_src>

<mosaic_0001>
module attributes {stable_mosaic.version = 11 : i64} {
  func.func @_fused_forward_kernel(%arg0: i32, %arg1: memref<64x640xf32, #tpu.memory_space<vmem>>, %arg2: memref<1x8x64xf32, #tpu.memory_space<vmem>>, %arg3: memref<640x128xf32, #tpu.memory_space<vmem>>, %arg4: memref<1x128xf32, #tpu.memory_space<vmem>>, %arg5: memref<128x128xf32, #tpu.memory_space<vmem>>, %arg6: memref<1x128xf32, #tpu.memory_space<vmem>>, %arg7: memref<128x128xf32, #tpu.memory_space<vmem>>, %arg8: memref<1x128xf32, #tpu.memory_space<vmem>>, %arg9: memref<128x128xf32, #tpu.memory_space<vmem>>, %arg10: memref<1x128xf32, #tpu.memory_space<vmem>>, %arg11: memref<8x128xf32, #tpu.memory_space<vmem>>) attributes {dimension_semantics = [#tpu.dimension_semantics<parallel>], iteration_bounds = array<i64: 1>, scalar_prefetch = 0 : i64, scratch_operands = 0 : i64, tpu.core_type = #tpu.core_type<tc>, window_params = [{transform_indices = @transform_0, window_bounds = array<i64: 64, 640>}, {transform_indices = @transform_1, window_bounds = array<i64: 1, 8, 64>}, {pipeline_mode = #tpu.pipeline_mode<synchronous>, transform_indices = @transform_2, window_bounds = array<i64: 640, 128>}, {pipeline_mode = #tpu.pipeline_mode<synchronous>, transform_indices = @transform_3, window_bounds = array<i64: 1, 128>}, {pipeline_mode = #tpu.pipeline_mode<synchronous>, transform_indices = @transform_4, window_bounds = array<i64: 128, 128>}, {pipeline_mode = #tpu.pipeline_mode<synchronous>, transform_indices = @transform_5, window_bounds = array<i64: 1, 128>}, {pipeline_mode = #tpu.pipeline_mode<synchronous>, transform_indices = @transform_6, window_bounds = array<i64: 128, 128>}, {pipeline_mode = #tpu.pipeline_mode<synchronous>, transform_indices = @transform_7, window_bounds = array<i64: 1, 128>}, {pipeline_mode = #tpu.pipeline_mode<synchronous>, transform_indices = @transform_8, window_bounds = array<i64: 128, 128>}, {pipeline_mode = #tpu.pipeline_mode<synchronous>, transform_indices = @transform_9, window_bounds = array<i64: 1, 128>}, {transform_indices = @transform_10, window_bounds = array<i64: 8, 128>}]} {
    %c0 = arith.constant 0 : index
    %c0_0 = arith.constant 0 : index
    %0 = vector.load %arg1[%c0, %c0_0] : memref<64x640xf32, #tpu.memory_space<vmem>>, vector<64x640xf32>
    %c0_1 = arith.constant 0 : index
    %c0_2 = arith.constant 0 : index
    %1 = vector.load %arg3[%c0_1, %c0_2] : memref<640x128xf32, #tpu.memory_space<vmem>>, vector<640x128xf32>
    %c0_3 = arith.constant 0 : index
    %c0_4 = arith.constant 0 : index
    %2 = vector.load %arg4[%c0_3, %c0_4] : memref<1x128xf32, #tpu.memory_space<vmem>>, vector<1x128xf32>
    %cst = arith.constant dense<0.000000e+00> : vector<64x128xf32>
    %3 = tpu.matmul %0, %1, %cst {dimension_numbers = #tpu.dot_dimension_numbers<[1], [0], [0], [1], [0, 0, 1, 1], [], []>} : vector<64x640xf32>, vector<640x128xf32>, vector<64x128xf32> -> vector<64x128xf32>
    %4 = vector.broadcast %2 : vector<1x128xf32> to vector<64x128xf32>
    %5 = arith.addf %3, %4 : vector<64x128xf32>
    %cst_5 = arith.constant 0.000000e+00 : f32
    %6 = vector.broadcast %cst_5 : f32 to vector<64x128xf32>
    %7 = arith.maximumf %5, %6 : vector<64x128xf32>
    %c0_6 = arith.constant 0 : index
    %c0_7 = arith.constant 0 : index
    %8 = vector.load %arg5[%c0_6, %c0_7] : memref<128x128xf32, #tpu.memory_space<vmem>>, vector<128x128xf32>
    %c0_8 = arith.constant 0 : index
    %c0_9 = arith.constant 0 : index
    %9 = vector.load %arg6[%c0_8, %c0_9] : memref<1x128xf32, #tpu.memory_space<vmem>>, vector<1x128xf32>
    %cst_10 = arith.constant dense<0.000000e+00> : vector<64x128xf32>
    %10 = tpu.matmul %7, %8, %cst_10 {dimension_numbers = #tpu.dot_dimension_numbers<[1], [0], [0], [1], [0, 0, 1, 1], [], []>} : vector<64x128xf32>, vector<128x128xf32>, vector<64x128xf32> -> vector<64x128xf32>
    %11 = vector.broadcast %9 : vector<1x128xf32> to vector<64x128xf32>
    %12 = arith.addf %10, %11 : vector<64x128xf32>
    %c0_11 = arith.constant 0 : index
    %c0_12 = arith.constant 0 : index
    %c0_13 = arith.constant 0 : index
    %13 = vector.load %arg2[%c0_11, %c0_12, %c0_13] : memref<1x8x64xf32, #tpu.memory_space<vmem>>, vector<1x8x64xf32>
    %14 = vector.shape_cast %13 : vector<1x8x64xf32> to vector<8x64xf32>
    %cst_14 = arith.constant dense<0.000000e+00> : vector<8x128xf32>
    %15 = tpu.matmul %14, %12, %cst_14 {dimension_numbers = #tpu.dot_dimension_numbers<[1], [0], [0], [1], [0, 0, 1, 1], [], []>} : vector<8x64xf32>, vector<64x128xf32>, vector<8x128xf32> -> vector<8x128xf32>
    %c0_15 = arith.constant 0 : index
    %c0_16 = arith.constant 0 : index
    %16 = vector.load %arg7[%c0_15, %c0_16] : memref<128x128xf32, #tpu.memory_space<vmem>>, vector<128x128xf32>
    %c0_17 = arith.constant 0 : index
    %c0_18 = arith.constant 0 : index
    %17 = vector.load %arg8[%c0_17, %c0_18] : memref<1x128xf32, #tpu.memory_space<vmem>>, vector<1x128xf32>
    %cst_19 = arith.constant dense<0.000000e+00> : vector<8x128xf32>
    %18 = tpu.matmul %15, %16, %cst_19 {dimension_numbers = #tpu.dot_dimension_numbers<[1], [0], [0], [1], [0, 0, 1, 1], [], []>} : vector<8x128xf32>, vector<128x128xf32>, vector<8x128xf32> -> vector<8x128xf32>
    %19 = vector.broadcast %17 : vector<1x128xf32> to vector<8x128xf32>
    %20 = arith.addf %18, %19 : vector<8x128xf32>
    %cst_20 = arith.constant 0.000000e+00 : f32
    %21 = vector.broadcast %cst_20 : f32 to vector<8x128xf32>
    %22 = arith.maximumf %20, %21 : vector<8x128xf32>
    %c0_21 = arith.constant 0 : index
    %c0_22 = arith.constant 0 : index
    %23 = vector.load %arg9[%c0_21, %c0_22] : memref<128x128xf32, #tpu.memory_space<vmem>>, vector<128x128xf32>
    %c0_23 = arith.constant 0 : index
    %c0_24 = arith.constant 0 : index
    %24 = vector.load %arg10[%c0_23, %c0_24] : memref<1x128xf32, #tpu.memory_space<vmem>>, vector<1x128xf32>
    %cst_25 = arith.constant dense<0.000000e+00> : vector<8x128xf32>
    %25 = tpu.matmul %22, %23, %cst_25 {dimension_numbers = #tpu.dot_dimension_numbers<[1], [0], [0], [1], [0, 0, 1, 1], [], []>} : vector<8x128xf32>, vector<128x128xf32>, vector<8x128xf32> -> vector<8x128xf32>
    %26 = vector.broadcast %24 : vector<1x128xf32> to vector<8x128xf32>
    %27 = arith.addf %25, %26 : vector<8x128xf32>
    %28 = math.tanh %27 : vector<8x128xf32>
    %cst_26 = arith.constant 8.000000e+00 : f32
    %29 = vector.broadcast %cst_26 : f32 to vector<8x128xf32>
    %30 = arith.mulf %28, %29 : vector<8x128xf32>
    %c0_27 = arith.constant 0 : index
    %c0_28 = arith.constant 0 : index
    %31 = vector.load %arg11[%c0_27, %c0_28] : memref<8x128xf32, #tpu.memory_space<vmem>>, vector<8x128xf32>
    tpu.vector_store %arg11[%c0_27, %c0_28], %30 {strides = array<i32>} : memref<8x128xf32, #tpu.memory_space<vmem>>, vector<8x128xf32>,
    return
  }
  func.func @transform_0(%arg0: i32) -> (i32, i32) {
    %c0_i32 = arith.constant 0 : i32
    %c0_i32_0 = arith.constant 0 : i32
    return %arg0, %c0_i32 : i32, i32
  }
  func.func @transform_1(%arg0: i32) -> (i32, i32, i32) {
    %c0_i32 = arith.constant 0 : i32
    %c0_i32_0 = arith.constant 0 : i32
    %c0_i32_1 = arith.constant 0 : i32
    return %arg0, %c0_i32, %c0_i32_0 : i32, i32, i32
  }
  func.func @transform_2(%arg0: i32) -> (i32, i32) {
    %c0_i32 = arith.constant 0 : i32
    %c0_i32_0 = arith.constant 0 : i32
    %c0_i32_1 = arith.constant 0 : i32
    return %c0_i32, %c0_i32_0 : i32, i32
  }
  func.func @transform_3(%arg0: i32) -> (i32, i32) {
    %c0_i32 = arith.constant 0 : i32
    %c0_i32_0 = arith.constant 0 : i32
    %c0_i32_1 = arith.constant 0 : i32
    return %c0_i32, %c0_i32_0 : i32, i32
  }
  func.func @transform_4(%arg0: i32) -> (i32, i32) {
    %c0_i32 = arith.constant 0 : i32
    %c0_i32_0 = arith.constant 0 : i32
    %c0_i32_1 = arith.constant 0 : i32
    return %c0_i32, %c0_i32_0 : i32, i32
  }
  func.func @transform_5(%arg0: i32) -> (i32, i32) {
    %c0_i32 = arith.constant 0 : i32
    %c0_i32_0 = arith.constant 0 : i32
    %c0_i32_1 = arith.constant 0 : i32
    return %c0_i32, %c0_i32_0 : i32, i32
  }
  func.func @transform_6(%arg0: i32) -> (i32, i32) {
    %c0_i32 = arith.constant 0 : i32
    %c0_i32_0 = arith.constant 0 : i32
    %c0_i32_1 = arith.constant 0 : i32
    return %c0_i32, %c0_i32_0 : i32, i32
  }
  func.func @transform_7(%arg0: i32) -> (i32, i32) {
    %c0_i32 = arith.constant 0 : i32
    %c0_i32_0 = arith.constant 0 : i32
    %c0_i32_1 = arith.constant 0 : i32
    return %c0_i32, %c0_i32_0 : i32, i32
  }
  func.func @transform_8(%arg0: i32) -> (i32, i32) {
    %c0_i32 = arith.constant 0 : i32
    %c0_i32_0 = arith.constant 0 : i32
    %c0_i32_1 = arith.constant 0 : i32
    return %c0_i32, %c0_i32_0 : i32, i32
  }
  func.func @transform_9(%arg0: i32) -> (i32, i32) {
    %c0_i32 = arith.constant 0 : i32
    %c0_i32_0 = arith.constant 0 : i32
    %c0_i32_1 = arith.constant 0 : i32
    return %c0_i32, %c0_i32_0 : i32, i32
  }
  func.func @transform_10(%arg0: i32) -> (i32, i32) {
    %c0_i32 = arith.constant 0 : i32
    %c0_i32_0 = arith.constant 0 : i32
    return %arg0, %c0_i32 : i32, i32
  }
}

</mosaic_0001>

<bundles_post_ra>
// kernel: tpu_custom_call.1
= control target key start
LH: loop header
LB: loop body
LE: loop exit
PB: predicated region body
PF: predicated region fallthrough
CT: control target
= control target key end

     0   :  { %15 = vsyncpa [#allocation3], 0  ;;  %s1933_s0 = inlined_call_operand.hbm [shape: f32[64,640], index: 0, kind: input, shape index: {}]   ;;  %s1934_s1 = inlined_call_operand.hbm [shape: f32[1,8,64], index: 1, kind: input, shape index: {}]   ;;  %s1935_s2 = inlined_call_operand.hbm [shape: f32[640,128], index: 2, kind: input, shape index: {}]   ;;  %s1936_s3 = inlined_call_operand.vmem [shape: f32[1,128], index: 3, kind: input, shape index: {}]   ;;  %s1937_s4 = inlined_call_operand.hbm [shape: f32[128,128], index: 4, kind: input, shape index: {}]   ;;  %s1938_s5 = inlined_call_operand.vmem [shape: f32[1,128], index: 5, kind: input, shape index: {}]   ;;  %s1939_s6 = inlined_call_operand.hbm [shape: f32[128,128], index: 6, kind: input, shape index: {}]   ;;  %s1940_s7 = inlined_call_operand.vmem [shape: f32[1,128], index: 7, kind: input, shape index: {}]   ;;  %s1941_s8 = inlined_call_operand.hbm [shape: f32[128,128], index: 8, kind: input, shape index: {}]   ;;  %s1942_s9 = inlined_call_operand.vmem [shape: f32[1,128], index: 9, kind: input, shape index: {}]   ;;  %s1943_s10 = inlined_call_operand.hbm [shape: f32[8,128], index: 10, kind: output, shape index: {}]  }
   0x1   :  { %16 = vsyncpa [#allocation6], 0 }
   0x2   :  { %17 = vsyncpa [#allocation9], 0 }
   0x3   :  { %18 = vsyncpa [#allocation12], 0 }
   0x4   :  { %19 = vsyncpa [#allocation4], 0  ;;  %s1730_s13 = smov [#allocation5]   ;;  %s1566_s17 = scalar_lea.hbm %s1934_s1, 128 }
   0x5   :  { %s38_s14 = sshll.u32 %s1730_s13, 4  ;;  %p1567_p0 = scmp.ne.s32.totalorder %s1934_s1, %s1566_s17  ;;  %s39_s14 = int_to_ptr.vmem [resolvable:$true] %s38_s14 }
   0x6   :  { %p1570_p1 = scmp.lt.u32.totalorder %s1566_s17, %s1934_s1 }
   0x8   :  { %p1572_p2 = pnand %p1570_p1, %p1567_p0 }
   0xa   :  { %1575 = shalt.err (!%p1572_p2)
}
   0xb   :  { %s1576_s22 = scalar_lea.vmem %s39_s14, 128  ;;  %p1581_p4 = scmp.lt.s32.totalorder %s39_s14, %s39_s14 }
   0xc   :  { %p1577_p3 = scmp.ne.s32.totalorder %s39_s14, %s1576_s22  ;;  %p1582_p5 = scmp.lt.s32.totalorder %s1576_s22, %s1576_s22 }
   0xe   :  { %p1583_p6 = por %p1582_p5, %p1581_p4 }
  0x10   :  { %p1584_p7 = pnand %p1583_p6, %p1577_p3 }
  0x12   :  { %1587 = shalt.err (!%p1584_p7)
}
  0x13   :  { %41 = dma.hbm_to_vmem [thread:$0]  %s1934_s1, 128, %s39_s14, [#allocation6]  }
  0x14   :  { %s1731_s25 = smov [#allocation8]   ;;  %s1732_s27 = smov [#allocation2]  }
  0x15   :  { %s61_s26 = sshll.u32 %s1731_s25, 4  ;;  %s25_s28 = sshll.u32 %s1732_s27, 4  ;;  %s62_s26 = int_to_ptr.vmem [resolvable:$true] %s61_s26  ;;  %s26_s28 = int_to_ptr.vmem [resolvable:$true] %s25_s28 }
  0x16   :  { %s1588_s11 = scalar_lea.hbm %s1937_s4, 2048 }
  0x17   :  { %p1589_p8 = scmp.ne.s32.totalorder %s1937_s4, %s1588_s11  ;;  %p1592_p9 = scmp.lt.u32.totalorder %s1588_s11, %s1937_s4 }
  0x19   :  { %p1594_p10 = pnand %p1592_p9, %p1589_p8 }
  0x1b   :  { %1597 = shalt.err (!%p1594_p10)
}
  0x1c   :  { %s1598_s1 = scalar_lea.vmem %s62_s26, 2048  ;;  %p1603_p12 = scmp.lt.s32.totalorder %s62_s26, %s62_s26 }
  0x1d   :  { %p1599_p11 = scmp.ne.s32.totalorder %s62_s26, %s1598_s1  ;;  %p1604_p13 = scmp.lt.s32.totalorder %s1598_s1, %s1598_s1 }
  0x1f   :  { %p1605_p0 = por %p1604_p13, %p1603_p12 }
  0x21   :  { %p1606_p1 = pnand %p1605_p0, %p1599_p11 }
  0x23   :  { %1609 = shalt.err (!%p1606_p1)
}
  0x24   :  { %s1733_s14 = smov 128   ;;  %s1734_s17 = smov 8  }
  0x25   :  { %67 = dma.hbm_to_vmem [thread:$0]  %s1937_s4, 2048, %s62_s26, [#allocation9], %s1733_s14, %s1733_s14, %s1734_s17  }
  0x26   :  { %s1610_s22 = scalar_lea.hbm %s1933_s0, 5120 }
  0x27   :  { %p1611_p2 = scmp.ne.s32.totalorder %s1933_s0, %s1610_s22  ;;  %p1614_p3 = scmp.lt.u32.totalorder %s1610_s22, %s1933_s0 }
  0x29   :  { %p1616_p4 = pnand %p1614_p3, %p1611_p2 }
  0x2b   :  { %1619 = shalt.err (!%p1616_p4)
}
  0x2c   :  { %s1620_s29 = scalar_lea.vmem %s26_s28, 5120  ;;  %p1625_p6 = scmp.lt.s32.totalorder %s26_s28, %s26_s28 }
  0x2d   :  { %p1621_p5 = scmp.ne.s32.totalorder %s26_s28, %s1620_s29  ;;  %p1626_p7 = scmp.lt.s32.totalorder %s1620_s29, %s1620_s29 }
  0x2f   :  { %p1627_p8 = por %p1626_p7, %p1625_p6 }
  0x31   :  { %p1628_p9 = pnand %p1627_p8, %p1621_p5 }
  0x33   :  { %1631 = shalt.err (!%p1628_p9)
}
  0x34   :  { %s1735_s4 = smov 640   ;;  %s1736_s26 = smov 40  }
  0x35   :  { %31 = dma.hbm_to_vmem [thread:$0]  %s1933_s0, 5120, %s26_s28, [#allocation3], %s1735_s4, %s1735_s4, %s1736_s26  }
  0x36   :  { %s1737_s12 = smov [#allocation7]   ;;  %s1738_s15 = smov [#allocation10]  }
  0x37   :  { %s47_s13 = sshll.u32 %s1737_s12, 4  ;;  %s75_s16 = sshll.u32 %s1738_s15, 4  ;;  %s48_s13 = int_to_ptr.vmem [resolvable:$true] %s47_s13  ;;  %s76_s16 = int_to_ptr.vmem [resolvable:$true] %s75_s16 }
  0x38   :  { %s1632_s19 = scalar_lea.hbm %s1935_s2, 10240 }
  0x39   :  { %p1633_p10 = scmp.ne.s32.totalorder %s1935_s2, %s1632_s19  ;;  %p1636_p11 = scmp.lt.u32.totalorder %s1632_s19, %s1935_s2 }
  0x3b   :  { %p1638_p12 = pnand %p1636_p11, %p1633_p10 }
  0x3d   :  { %1641 = shalt.err (!%p1638_p12)
}
  0x3e   :  { %s1642_s0 = scalar_lea.vmem %s48_s13, 10240  ;;  %p1647_p0 = scmp.lt.s32.totalorder %s48_s13, %s48_s13 }
  0x3f   :  { %p1643_p13 = scmp.ne.s32.totalorder %s48_s13, %s1642_s0  ;;  %p1648_p1 = scmp.lt.s32.totalorder %s1642_s0, %s1642_s0 }
  0x41   :  { %p1649_p2 = por %p1648_p1, %p1647_p0 }
  0x43   :  { %p1650_p3 = pnand %p1649_p2, %p1643_p13 }
  0x45   :  { %1653 = shalt.err (!%p1650_p3)
}
  0x46   :  { %53 = dma.hbm_to_vmem [thread:$0]  %s1935_s2, 10240, %s48_s13, [#allocation6], %s1733_s14, %s1733_s14, %s1734_s17  }
  0x47   :  { %s1654_s29 = scalar_lea.hbm %s1939_s6, 2048 }
  0x48   :  { %p1655_p4 = scmp.ne.s32.totalorder %s1939_s6, %s1654_s29  ;;  %p1658_p5 = scmp.lt.u32.totalorder %s1654_s29, %s1939_s6 }
  0x4a   :  { %p1660_p6 = pnand %p1658_p5, %p1655_p4 }
  0x4c   :  { %1663 = shalt.err (!%p1660_p6)
}
  0x4d   :  { %s1664_s12 = scalar_lea.vmem %s76_s16, 2048  ;;  %p1669_p8 = scmp.lt.s32.totalorder %s76_s16, %s76_s16 }
  0x4e   :  { %p1665_p7 = scmp.ne.s32.totalorder %s76_s16, %s1664_s12  ;;  %p1670_p9 = scmp.lt.s32.totalorder %s1664_s12, %s1664_s12 }
  0x50   :  { %p1671_p10 = por %p1670_p9, %p1669_p8 }
  0x52   :  { %p1672_p11 = pnand %p1671_p10, %p1665_p7 }
  0x54   :  { %1675 = shalt.err (!%p1672_p11)
}
  0x55   :  { %81 = dma.hbm_to_vmem [thread:$0]  %s1939_s6, 2048, %s76_s16, [#allocation9], %s1733_s14, %s1733_s14, %s1734_s17  }
  0x56   :  { %s1739_s15 = smov [#allocation11]   ;;  %s1676_s20 = scalar_lea.hbm %s1941_s8, 2048 }
  0x57   :  { %s89_s1 = sshll.u32 %s1739_s15, 4  ;;  %p1677_p12 = scmp.ne.s32.totalorder %s1941_s8, %s1676_s20  ;;  %s90_s1 = int_to_ptr.vmem [resolvable:$true] %s89_s1 }
  0x58   :  { %p1680_p13 = scmp.lt.u32.totalorder %s1676_s20, %s1941_s8 }
  0x5a   :  { %p1682_p0 = pnand %p1680_p13, %p1677_p12 }
  0x5c   :  { %1685 = shalt.err (!%p1682_p0)
}
  0x5d   :  { %s1686_s28 = scalar_lea.vmem %s90_s1, 2048  ;;  %p1691_p2 = scmp.lt.s32.totalorder %s90_s1, %s90_s1 }
  0x5e   :  { %p1687_p1 = scmp.ne.s32.totalorder %s90_s1, %s1686_s28  ;;  %p1692_p3 = scmp.lt.s32.totalorder %s1686_s28, %s1686_s28 }
  0x60   :  { %p1693_p4 = por %p1692_p3, %p1691_p2 }
  0x62   :  { %p1694_p5 = pnand %p1693_p4, %p1687_p1 }
  0x64   :  { %1697 = shalt.err (!%p1694_p5)
}
  0x65   :  { %95 = dma.hbm_to_vmem [thread:$0]  %s1941_s8, 2048, %s90_s1, [#allocation12], %s1733_s14, %s1733_s14, %s1734_s17  }
  0x66   :  { %1720 = dma.done.wait [#allocation3], 5120  }
  0x67   :  { %1721 = vsyncadd [#allocation3], 4294962176 }
  0x68   :  { %1722 = dma.done.wait [#allocation6], 10368  }
  0x69   :  { %1723 = vsyncadd [#allocation6], 4294956928 }
  0x6a   :  { %1724 = dma.done.wait [#allocation9], 4096  }
  0x6b   :  { %1725 = vsyncadd [#allocation9], 4294963200 }
  0x6c   :  { %1726 = dma.done.wait [#allocation12], 2048  }
  0x6d   :  { %1727 = vsyncadd [#allocation12], 4294965248  ;;  %v172_v0 = vld [vmem:[#allocation7 + $0x80] sm:$0xff]  ;;  %v173_v1 = vld [vmem:[#allocation7 + $0x88] sm:$0xff]  ;;  %vm1741_vm0 = vmmov 0   ;;  %vm695_vm1 = vcmask 523264  }
  0x6e   :  { %v156_v2 = vld [vmem:[#allocation7] sm:$0xff]  ;;  %v1362_v3 = vpack.c.bf16 %v173_v1, %v172_v0  ;;  %v157_v4 = vld [vmem:[#allocation7 + $0x8] sm:$0xff]  ;;  %v174_v11 = vld [vmem:[#allocation7 + $0x90] sm:$0xff]  ;;  %s1743_s29 = smov [#allocation13]  }
  0x6f   :  { %v204_v5 = vld [vmem:[#allocation7 + $0x180] sm:$0xff]  ;;  %v205_v6 = vld [vmem:[#allocation7 + $0x188] sm:$0xff]  ;;  %v1364_v7 = vpack.c.bf16 %v157_v4, %v156_v2  ;;  %v175_v13 = vld [vmem:[#allocation7 + $0x98] sm:$0xff]  ;;  %s965_s4 = sshll.u32 %s1743_s29, 4  ;;  %s966_s4 = int_to_ptr.vmem [resolvable:$true] %s965_s4 }
  0x70   :  { %v1394_v8 = vpack.c.bf16 %v205_v6, %v204_v5  ;;  %v188_v9 = vld [vmem:[#allocation7 + $0x100] sm:$0xff]  ;;  %v189_v10 = vld [vmem:[#allocation7 + $0x108] sm:$0xff]  ;;  %1363 = vmatprep.subr.bf16.mxu0 %v1362_v3  ;;  %v158_v14 = vld [vmem:[#allocation7 + $0x10] sm:$0xff]  ;;  %v1366_v16 = vpack.c.bf16 %v175_v13, %v174_v11  ;;  %p1703_p7 = scmp.lt.s32.totalorder %s966_s4, %s966_s4 }
  0x71   :  { %v1396_v12 = vpack.c.bf16 %v189_v10, %v188_v9  ;;  %v159_v15 = vld [vmem:[#allocation7 + $0x18] sm:$0xff]  ;;  %1365 = vmatpush3.bf16.msra.mxu0 %v1364_v7  ;;  %v206_v18 = vld [vmem:[#allocation7 + $0x190] sm:$0xff]  ;;  %v176_v23 = vld [vmem:[#allocation7 + $0xa0] sm:$0xff] }
  0x72   :  { %1395 = vmatprep.subr.bf16.mxu1 %v1394_v8  ;;  %v1368_v17 = vpack.c.bf16 %v159_v15, %v158_v14  ;;  %v207_v19 = vld [vmem:[#allocation7 + $0x198] sm:$0xff]  ;;  %v190_v20 = vld [vmem:[#allocation7 + $0x110] sm:$0xff]  ;;  %v177_v24 = vld [vmem:[#allocation7 + $0xa8] sm:$0xff]  ;;  %1367 = vmatprep.subr.bf16.mxu0 %v1366_v16 }
  0x73   :  { %1397 = vmatpush3.bf16.msra.mxu1 %v1396_v12  ;;  %v1398_v21 = vpack.c.bf16 %v207_v19, %v206_v18  ;;  %v191_v22 = vld [vmem:[#allocation7 + $0x118] sm:$0xff]  ;;  %v1370_v26 = vpack.c.bf16 %v177_v24, %v176_v23  ;;  %v160_v27 = vld [vmem:[#allocation7 + $0x20] sm:$0xff]  ;;  %v161_v28 = vld [vmem:[#allocation7 + $0x28] sm:$0xff] }
  0x74   :  { %v1400_v25 = vpack.c.bf16 %v191_v22, %v190_v20  ;;  %v208_v29 = vld [vmem:[#allocation7 + $0x1a0] sm:$0xff]  ;;  %v209_v30 = vld [vmem:[#allocation7 + $0x1a8] sm:$0xff]  ;;  %v1372_v33 = vpack.c.bf16 %v161_v28, %v160_v27  ;;  %v178_v35 = vld [vmem:[#allocation7 + $0xb0] sm:$0xff] }
  0x75   :  { %1399 = vmatprep.subr.bf16.mxu1 %v1398_v21  ;;  %v192_v31 = vld [vmem:[#allocation7 + $0x120] sm:$0xff]  ;;  %v193_v32 = vld [vmem:[#allocation7 + $0x128] sm:$0xff]  ;;  %1369 = vmatpush3.bf16.msra.mxu0 %v1368_v17  ;;  %v1402_v34 = vpack.c.bf16 %v209_v30, %v208_v29  ;;  %v179_v36 = vld [vmem:[#allocation7 + $0xb8] sm:$0xff] }
  0x76   :  { %v162_v37 = vld [vmem:[#allocation7 + $0x30] sm:$0xff]  ;;  %1371 = vmatprep.subr.bf16.mxu0 %v1370_v26  ;;  %v1404_v38 = vpack.c.bf16 %v193_v32, %v192_v31  ;;  %v1374_v39 = vpack.c.bf16 %v179_v36, %v178_v35  ;;  %v163_v40 = vld [vmem:[#allocation7 + $0x38] sm:$0xff]  ;;  %v180_v46 = vld [vmem:[#allocation7 + $0xc0] sm:$0xff] }
  0x77   :  { %1401 = vmatpush3.bf16.msra.mxu1 %v1400_v25  ;;  %v210_v41 = vld [vmem:[#allocation7 + $0x1b0] sm:$0xff]  ;;  %v211_v42 = vld [vmem:[#allocation7 + $0x1b8] sm:$0xff]  ;;  %v181_v47 = vld [vmem:[#allocation7 + $0xc8] sm:$0xff]  ;;  %v1376_v48 = vpack.c.bf16 %v163_v40, %v162_v37 }
  0x78   :  { %1403 = vmatprep.subr.bf16.mxu1 %v1402_v34  ;;  %v1406_v43 = vpack.c.bf16 %v211_v42, %v210_v41  ;;  %v194_v44 = vld [vmem:[#allocation7 + $0x130] sm:$0xff]  ;;  %v195_v45 = vld [vmem:[#allocation7 + $0x138] sm:$0xff]  ;;  %v212_v49 = vld [vmem:[#allocation7 + $0x1c0] sm:$0xff]  ;;  %v1378_v52 = vpack.c.bf16 %v181_v47, %v180_v46 }
  0x79   :  { %1373 = vmatpush3.bf16.msra.mxu0 %v1372_v33  ;;  %v213_v50 = vld [vmem:[#allocation7 + $0x1c8] sm:$0xff]  ;;  %v1408_v51 = vpack.c.bf16 %v195_v45, %v194_v44  ;;  %v164_v53 = vld [vmem:[#allocation7 + $0x40] sm:$0xff]  ;;  %v182_v58 = vld [vmem:[#allocation7 + $0xd0] sm:$0xff] }
  0x7a   :  { %1375 = vmatprep.subr.bf16.mxu0 %v1374_v39  ;;  %v165_v54 = vld [vmem:[#allocation7 + $0x48] sm:$0xff]  ;;  %v196_v55 = vld [vmem:[#allocation7 + $0x140] sm:$0xff]  ;;  %v1410_v56 = vpack.c.bf16 %v213_v50, %v212_v49  ;;  %v183_v59 = vld [vmem:[#allocation7 + $0xd8] sm:$0xff] }
  0x7b   :  { %1405 = vmatpush3.bf16.msra.mxu1 %v1404_v38  ;;  %v197_v57 = vld [vmem:[#allocation7 + $0x148] sm:$0xff]  ;;  %v214_v60 = vld [vmem:[#allocation7 + $0x1d0] sm:$0xff]  ;;  %v215_v61 = vld [vmem:[#allocation7 + $0x1d8] sm:$0xff]  ;;  %v1380_v62 = vpack.c.bf16 %v165_v54, %v164_v53  ;;  %v1382_v0 = vpack.c.bf16 %v183_v59, %v182_v58 }
  0x7c   :  { %1407 = vmatprep.subr.bf16.mxu1 %v1406_v43  ;;  %v1412_v63 = vpack.c.bf16 %v197_v57, %v196_v55  ;;  %v166_v1 = vld [vmem:[#allocation7 + $0x50] sm:$0xff]  ;;  %v167_v2 = vld [vmem:[#allocation7 + $0x58] sm:$0xff]  ;;  %v1414_v4 = vpack.c.bf16 %v215_v61, %v214_v60  ;;  %v184_v6 = vld [vmem:[#allocation7 + $0xe0] sm:$0xff] }
  0x7d   :  { %1377 = vmatpush3.bf16.msra.mxu0 %v1376_v48  ;;  %v198_v3 = vld [vmem:[#allocation7 + $0x150] sm:$0xff]  ;;  %v199_v5 = vld [vmem:[#allocation7 + $0x158] sm:$0xff]  ;;  %v185_v7 = vld [vmem:[#allocation7 + $0xe8] sm:$0xff]  ;;  %v1384_v10 = vpack.c.bf16 %v167_v2, %v166_v1 }
  0x7e   :  { %1379 = vmatprep.subr.bf16.mxu0 %v1378_v52  ;;  %v216_v8 = vld [vmem:[#allocation7 + $0x1e0] sm:$0xff]  ;;  %v217_v9 = vld [vmem:[#allocation7 + $0x1e8] sm:$0xff]  ;;  %v1416_v13 = vpack.c.bf16 %v199_v5, %v198_v3  ;;  %v1386_v14 = vpack.c.bf16 %v185_v7, %v184_v6  ;;  %v186_v19 = vld [vmem:[#allocation7 + $0xf0] sm:$0xff] }
  0x7f   :  { %1409 = vmatpush3.bf16.msra.mxu1 %v1408_v51  ;;  %v168_v11 = vld [vmem:[#allocation7 + $0x60] sm:$0xff]  ;;  %v169_v15 = vld [vmem:[#allocation7 + $0x68] sm:$0xff]  ;;  %v1418_v18 = vpack.c.bf16 %v217_v9, %v216_v8  ;;  %v187_v20 = vld [vmem:[#allocation7 + $0xf8] sm:$0xff] }
  0x80   :  { %1411 = vmatprep.subr.bf16.mxu1 %v1410_v56  ;;  %v117_v12 = vld [vmem:[#allocation2 + $0x8] sm:$0xff]  ;;  %v201_v17 = vld [vmem:[#allocation7 + $0x168] sm:$0xff]  ;;  %v119_v21 = vld [vmem:[#allocation2 + $0x18] sm:$0xff]  ;;  %v1388_v24 = vpack.c.bf16 %v169_v15, %v168_v11  ;;  %v1390_v26 = vpack.c.bf16 %v187_v20, %v186_v19 }
  0x81   :  { %1381 = vmatpush3.bf16.msra.mxu0 %v1380_v62  ;;  %v200_v16 = vld [vmem:[#allocation7 + $0x160] sm:$0xff]  ;;  %307 = vmatprep.mubr.f32.mxu0 %v117_v12  ;;  %v218_v22 = vld [vmem:[#allocation7 + $0x1f0] sm:$0xff]  ;;  %v219_v23 = vld [vmem:[#allocation7 + $0x1f8] sm:$0xff] }
  0x82   :  { %1383 = vmatprep.subr.bf16.mxu0 %v1382_v0  ;;  %412 = vmatprep.mubr.f32.mxu1 %v119_v21  ;;  %v1420_v25 = vpack.c.bf16 %v201_v17, %v200_v16  ;;  %v170_v27 = vld [vmem:[#allocation7 + $0x70] sm:$0xff]  ;;  %v171_v28 = vld [vmem:[#allocation7 + $0x78] sm:$0xff]  ;;  %v1422_v30 = vpack.c.bf16 %v219_v23, %v218_v22  ;;  %v220_v32 = vld [vmem:[#allocation7 + $0x200] sm:$0xff] }
  0x83   :  { %1413 = vmatpush3.bf16.msra.mxu1 %v1412_v63  ;;  %v202_v29 = vld [vmem:[#allocation7 + $0x170] sm:$0xff]  ;;  %v203_v31 = vld [vmem:[#allocation7 + $0x178] sm:$0xff]  ;;  %v221_v33 = vld [vmem:[#allocation7 + $0x208] sm:$0xff]  ;;  %v1392_v34 = vpack.c.bf16 %v171_v28, %v170_v27 }
  0x84   :  { %1415 = vmatprep.subr.bf16.mxu1 %v1414_v4  ;;  %v1424_v35 = vpack.c.bf16 %v203_v31, %v202_v29  ;;  %v1426_v36 = vpack.c.bf16 %v221_v33, %v220_v32  ;;  %v222_v37 = vld [vmem:[#allocation7 + $0x210] sm:$0xff]  ;;  %v223_v38 = vld [vmem:[#allocation7 + $0x218] sm:$0xff]  ;;  %v118_v40 = vld [vmem:[#allocation2 + $0x10] sm:$0xff] }
  0x85   :  { %1385 = vmatpush3.bf16.msra.mxu0 %v1384_v10  ;;  %v116_v39 = vld [vmem:[#allocation2] sm:$0xff]  ;;  %v1430_v41 = vpack.c.bf16 %v223_v38, %v222_v37  ;;  %v122_v42 = vld [vmem:[#allocation2 + $0x30] sm:$0xff]  ;;  %v224_v43 = vld [vmem:[#allocation7 + $0x220] sm:$0xff] }
  0x86   :  { %1387 = vmatprep.subr.bf16.mxu0 %v1386_v14  ;;  %v225_v44 = vld [vmem:[#allocation7 + $0x228] sm:$0xff]  ;;  %v124_v45 = vld [vmem:[#allocation2 + $0x40] sm:$0xff]  ;;  %v121_v46 = vld [vmem:[#allocation2 + $0x28] sm:$0xff] }
  0x87   :  { %1417 = vmatpush3.bf16.msra.mxu1 %v1416_v13  ;;  %v123_v47 = vld [vmem:[#allocation2 + $0x38] sm:$0xff]  ;;  %v1434_v48 = vpack.c.bf16 %v225_v44, %v224_v43  ;;  %v227_v51 = vld [vmem:[#allocation7 + $0x238] sm:$0xff]  ;;  %v129_v52 = vld [vmem:[#allocation2 + $0x68] sm:$0xff] }
  0x88   :  { %1419 = vmatprep.subr.bf16.mxu1 %v1418_v18  ;;  %v127_v49 = vld [vmem:[#allocation2 + $0x58] sm:$0xff]  ;;  %v126_v53 = vld [vmem:[#allocation2 + $0x50] sm:$0xff]  ;;  %v128_v54 = vld [vmem:[#allocation2 + $0x60] sm:$0xff] }
  0x89   :  { %1389 = vmatpush3.bf16.msra.mxu0 %v1388_v24  ;;  %v226_v50 = vld [vmem:[#allocation7 + $0x230] sm:$0xff]  ;;  %v132_v56 = vld [vmem:[#allocation2 + $0x80] sm:$0xff]  ;;  %v228_v57 = vld [vmem:[#allocation7 + $0x240] sm:$0xff] }
  0x8a   :  { %1391 = vmatprep.subr.bf16.mxu0 %v1390_v26  ;;  %v1438_v55 = vpack.c.bf16 %v227_v51, %v226_v50  ;;  %v229_v58 = vld [vmem:[#allocation7 + $0x248] sm:$0xff]  ;;  %v131_v60 = vld [vmem:[#allocation2 + $0x78] sm:$0xff]  ;;  %v133_v61 = vld [vmem:[#allocation2 + $0x88] sm:$0xff] }
  0x8b   :  { %1421 = vmatpush3.bf16.msra.mxu1 %v1420_v25  ;;  %v134_v59 = vld [vmem:[#allocation2 + $0x90] sm:$0xff]  ;;  %v1442_v62 = vpack.c.bf16 %v229_v58, %v228_v57  ;;  %v137_v63 = vld [vmem:[#allocation2 + $0xa8] sm:$0xff]  ;;  %v230_v0 = vld [vmem:[#allocation7 + $0x250] sm:$0xff] }
  0x8c   :  { %1423 = vmatprep.subr.bf16.mxu1 %v1422_v30  ;;  %v231_v1 = vld [vmem:[#allocation7 + $0x258] sm:$0xff]  ;;  %v139_v2 = vld [vmem:[#allocation2 + $0xb8] sm:$0xff]  ;;  %v138_v4 = vld [vmem:[#allocation2 + $0xb0] sm:$0xff] }
  0x8d   :  { %1393 = vmatpush3.bf16.msra.mxu0 %v1392_v34  ;;  %v136_v3 = vld [vmem:[#allocation2 + $0xa0] sm:$0xff]  ;;  %v1446_v5 = vpack.c.bf16 %v231_v1, %v230_v0  ;;  %v142_v6 = vld [vmem:[#allocation2 + $0xd0] sm:$0xff]  ;;  %v232_v7 = vld [vmem:[#allocation7 + $0x260] sm:$0xff] }
  0x8e   :  { %1427 = vmatprep.subr.bf16.mxu0 %v1426_v36  ;;  %v233_v8 = vld [vmem:[#allocation7 + $0x268] sm:$0xff]  ;;  %v144_v9 = vld [vmem:[#allocation2 + $0xe0] sm:$0xff]  ;;  %v141_v10 = vld [vmem:[#allocation2 + $0xc8] sm:$0xff] }
  0x8f   :  { %1425 = vmatpush3.bf16.msra.mxu1 %v1424_v35  ;;  %v143_v11 = vld [vmem:[#allocation2 + $0xd8] sm:$0xff]  ;;  %v1450_v12 = vpack.c.bf16 %v233_v8, %v232_v7  ;;  %v235_v15 = vld [vmem:[#allocation7 + $0x278] sm:$0xff]  ;;  %v149_v16 = vld [vmem:[#allocation2 + $0x108] sm:$0xff] }
  0x90   :  { %308 = vmatmul.mubr.f32.vlgmr.msra.gmra.mrb[0].mxu0 %v116_v39  ;;  %v147_v13 = vld [vmem:[#allocation2 + $0xf8] sm:$0xff]  ;;  %v146_v17 = vld [vmem:[#allocation2 + $0xf0] sm:$0xff]  ;;  %v148_v18 = vld [vmem:[#allocation2 + $0x100] sm:$0xff] }
  0x91   :  { %1429 = vmatpush3.bf16.msra.mxu0 %v1426_v36  ;;  %312 = vmatprep.mubr.f32.mxu0 %v122_v42  ;;  %v234_v14 = vld [vmem:[#allocation7 + $0x270] sm:$0xff]  ;;  %v152_v20 = vld [vmem:[#allocation2 + $0x120] sm:$0xff]  ;;  %v154_v21 = vld [vmem:[#allocation2 + $0x130] sm:$0xff] }
  0x92   :  { %413 = vmatmul.mubr.f32.vlgmr.msra.gmra.mrb[0].mxu1 %v118_v40  ;;  %1431 = vmatprep.subr.bf16.mxu0 %v1430_v41  ;;  %v1454_v19 = vpack.c.bf16 %v235_v15, %v234_v14  ;;  %v151_v22 = vld [vmem:[#allocation2 + $0x118] sm:$0xff]  ;;  %v153_v23 = vld [vmem:[#allocation2 + $0x128] sm:$0xff]  ;;  %v120_v24 = vld [vmem:[#allocation2 + $0x20] sm:$0xff] }
  0x93   :  { %417 = vmatprep.mubr.f32.mxu1 %v124_v45  ;;  %v125_v25 = vld [vmem:[#allocation2 + $0x48] sm:$0xff]  ;;  %v130_v26 = vld [vmem:[#allocation2 + $0x70] sm:$0xff]  ;;  %v135_v27 = vld [vmem:[#allocation2 + $0x98] sm:$0xff] }
  0x94   :  { %313 = vmatmul.mubr.f32.gmra.mrb[2].mxu0 %v121_v46  ;;  %v140_v28 = vld [vmem:[#allocation2 + $0xc0] sm:$0xff]  ;;  %v145_v29 = vld [vmem:[#allocation2 + $0xe8] sm:$0xff]  ;;  %v150_v30 = vld [vmem:[#allocation2 + $0x110] sm:$0xff] }
  0x95   :  { %1433 = vmatpush3.bf16.msra.mxu0 %v1430_v41  ;;  %317 = vmatprep.mubr.f32.mxu0 %v127_v49  ;;  %v155_v31 = vld [vmem:[#allocation2 + $0x138] sm:$0xff]  ;;  %v566_v32 = vld [vmem:[#allocation8] sm:$0xff]  ;;  %v567_v33 = vld [vmem:[#allocation8 + $0x8] sm:$0xff] }
  0x96   :  { %418 = vmatmul.mubr.f32.gmra.mrb[2].mxu1 %v123_v47  ;;  %1435 = vmatprep.subr.bf16.mxu0 %v1434_v48  ;;  %v1458_v34 = vpack.c.bf16 %v567_v33, %v566_v32  ;;  %v568_v35 = vld [vmem:[#allocation8 + $0x10] sm:$0xff]  ;;  %v569_v36 = vld [vmem:[#allocation8 + $0x18] sm:$0xff]  ;;  %v570_v38 = vld [vmem:[#allocation8 + $0x20] sm:$0xff] }
  0x97   :  { %422 = vmatprep.mubr.f32.mxu1 %v129_v52  ;;  %v1462_v37 = vpack.c.bf16 %v569_v36, %v568_v35  ;;  %v571_v39 = vld [vmem:[#allocation8 + $0x28] sm:$0xff]  ;;  %v572_v41 = vld [vmem:[#allocation8 + $0x30] sm:$0xff]  ;;  %v573_v42 = vld [vmem:[#allocation8 + $0x38] sm:$0xff] }
  0x98   :  { %318 = vmatmul.mubr.f32.gmra.mrb[4].mxu0 %v126_v53  ;;  %1459 = vmatprep.subr.bf16.mxu1 %v1458_v34  ;;  %v1466_v40 = vpack.c.bf16 %v571_v39, %v570_v38  ;;  %v1470_v43 = vpack.c.bf16 %v573_v42, %v572_v41  ;;  %v574_v44 = vld [vmem:[#allocation8 + $0x40] sm:$0xff]  ;;  %v575_v45 = vld [vmem:[#allocation8 + $0x48] sm:$0xff]  ;;  %v576_v47 = vld [vmem:[#allocation8 + $0x50] sm:$0xff] }
  0x99   :  { %1437 = vmatpush3.bf16.msra.mxu0 %v1434_v48  ;;  %322 = vmatprep.mubr.f32.mxu0 %v132_v56  ;;  %v1474_v46 = vpack.c.bf16 %v575_v45, %v574_v44  ;;  %v577_v48 = vld [vmem:[#allocation8 + $0x58] sm:$0xff]  ;;  %v578_v50 = vld [vmem:[#allocation8 + $0x60] sm:$0xff]  ;;  %v579_v51 = vld [vmem:[#allocation8 + $0x68] sm:$0xff] }
  0x9a   :  { %423 = vmatmul.mubr.f32.gmra.mrb[4].mxu1 %v128_v54  ;;  %1439 = vmatprep.subr.bf16.mxu0 %v1438_v55  ;;  %v1478_v49 = vpack.c.bf16 %v577_v48, %v576_v47  ;;  %v1482_v52 = vpack.c.bf16 %v579_v51, %v578_v50  ;;  %v580_v53 = vld [vmem:[#allocation8 + $0x70] sm:$0xff]  ;;  %v581_v54 = vld [vmem:[#allocation8 + $0x78] sm:$0xff] }
  0x9b   :  { %427 = vmatprep.mubr.f32.mxu1 %v134_v59  ;;  %1461 = vmatpush3.bf16.msra.mxu1 %v1458_v34  ;;  %v977_v57 = vld [vmem:[%s1936_s3] ss:$0 sm:$0xff] }
  0x9c   :  { %323 = vmatmul.mubr.f32.gmra.mrb[6].mxu0 %v131_v60  ;;  %1463 = vmatprep.subr.bf16.mxu1 %v1462_v37 }
  0x9d   :  { %1441 = vmatpush3.bf16.msra.mxu0 %v1438_v55  ;;  %327 = vmatprep.mubr.f32.mxu0 %v137_v63  ;;  %v1486_v55 = vpack.c.bf16 %v581_v54, %v580_v53 }
  0x9e   :  { %428 = vmatmul.mubr.f32.gmra.mrb[6].mxu1 %v133_v61  ;;  %1443 = vmatprep.subr.bf16.mxu0 %v1442_v62 }
  0x9f   :  { %432 = vmatprep.mubr.f32.mxu1 %v139_v2  ;;  %1465 = vmatpush3.bf16.msra.mxu1 %v1462_v37 }
  0xa0   :  { %328 = vmatmul.mubr.f32.gmra.mrb[8].mxu0 %v136_v3  ;;  %1467 = vmatprep.subr.bf16.mxu1 %v1466_v40 }
  0xa1   :  { %1445 = vmatpush3.bf16.msra.mxu0 %v1442_v62  ;;  %332 = vmatprep.mubr.f32.mxu0 %v142_v6 }
  0xa2   :  { %433 = vmatmul.mubr.f32.gmra.mrb[8].mxu1 %v138_v4  ;;  %1447 = vmatprep.subr.bf16.mxu0 %v1446_v5 }
  0xa3   :  { %437 = vmatprep.mubr.f32.mxu1 %v144_v9  ;;  %1469 = vmatpush3.bf16.msra.mxu1 %v1466_v40 }
  0xa4   :  { %333 = vmatmul.mubr.f32.gmra.mrb[10].mxu0 %v141_v10  ;;  %1471 = vmatprep.subr.bf16.mxu1 %v1470_v43 }
  0xa5   :  { %1449 = vmatpush3.bf16.msra.mxu0 %v1446_v5  ;;  %337 = vmatprep.mubr.f32.mxu0 %v147_v13 }
  0xa6   :  { %438 = vmatmul.mubr.f32.gmra.mrb[10].mxu1 %v143_v11  ;;  %1451 = vmatprep.subr.bf16.mxu0 %v1450_v12 }
  0xa7   :  { %442 = vmatprep.mubr.f32.mxu1 %v149_v16  ;;  %1473 = vmatpush3.bf16.msra.mxu1 %v1470_v43 }
  0xa8   :  { %338 = vmatmul.mubr.f32.gmra.mrb[12].mxu0 %v146_v17  ;;  %1475 = vmatprep.subr.bf16.mxu1 %v1474_v46 }
  0xa9   :  { %1453 = vmatpush3.bf16.msra.mxu0 %v1450_v12  ;;  %342 = vmatprep.mubr.f32.mxu0 %v152_v20 }
  0xaa   :  { %443 = vmatmul.mubr.f32.gmra.mrb[12].mxu1 %v148_v18  ;;  %1455 = vmatprep.subr.bf16.mxu0 %v1454_v19 }
  0xab   :  { %447 = vmatprep.mubr.f32.mxu1 %v154_v21  ;;  %1477 = vmatpush3.bf16.msra.mxu1 %v1474_v46 }
  0xac   :  { %343 = vmatmul.mubr.f32.gmra.mrb[14].mxu0 %v151_v22  ;;  %1479 = vmatprep.subr.bf16.mxu1 %v1478_v49 }
  0xad   :  { %1457 = vmatpush3.bf16.msra.mxu0 %v1454_v19  ;;  %1217 = vmatprep.mubr.f32.mxu0 %v120_v24 }
  0xae   :  { %448 = vmatmul.mubr.f32.gmra.mrb[14].mxu1 %v153_v23 }
  0xaf   :  { %1481 = vmatpush3.bf16.msra.mxu1 %v1478_v49 }
  0xb0   :  { %1218 = vmatmul.mubr.f32.vlgmr.msra.gmra.mrb[16].mxu0 %v125_v25  ;;  %1483 = vmatprep.subr.bf16.mxu1 %v1482_v52 }
  0xb1   :  { %1220 = vmatprep.mubr.f32.mxu0 %v130_v26 }
  0xb3   :  { %1485 = vmatpush3.bf16.msra.mxu1 %v1482_v52 }
  0xb4   :  { %1221 = vmatmul.mubr.f32.gmra.mrb[18].mxu0 %v135_v27  ;;  %1487 = vmatprep.subr.bf16.mxu1 %v1486_v55 }
  0xb5   :  { %1223 = vmatprep.mubr.f32.mxu0 %v140_v28 }
  0xb7   :  { %1489 = vmatpush3.bf16.msra.mxu1 %v1486_v55 }
  0xb8   :  { %1224 = vmatmul.mubr.f32.gmra.mrb[20].mxu0 %v145_v29 }
  0xb9   :  { %1226 = vmatprep.mubr.f32.mxu0 %v150_v30 }
  0xbc   :  { %1227 = vmatmul.mubr.f32.gmra.mrb[22].mxu0 %v155_v31 }
 0x163   :  { %v1014_v56 = vpop.f32.mrb[0].mxu0 }
 0x164   :  { %v1015_v58 = vpop.f32.mrb[1].mxu0 }
 0x165   :  { %v1070_v59 = vpop.f32.mrb[0].mxu1  ;;  %v1016_v60 = vadd.f32 %v1015_v58, %v1014_v56 }
 0x166   :  { %v1071_v61 = vpop.f32.mrb[1].mxu1 }
 0x167   :  { %v1072_v62 = vadd.f32 %v1071_v61, %v1070_v59  ;;  %v310_v63 = vadd.f32 %v1016_v60, %v977_v57  ;;  %v1017_v0 = vpop.f32.mrb[2].mxu0 }
 0x168   :  { %v1018_v1 = vpop.f32.mrb[3].mxu0 }
 0x169   :  { %v1073_v2 = vpop.f32.mrb[2].mxu1  ;;  %v1019_v3 = vadd.f32 %v1018_v1, %v1017_v0  ;;  %v415_v5 = vadd.f32 %v1072_v62, %v310_v63 }
 0x16a   :  { %v1074_v4 = vpop.f32.mrb[3].mxu1 }
 0x16b   :  { %v1075_v6 = vadd.f32 %v1074_v4, %v1073_v2  ;;  %v315_v7 = vadd.f32 %v1019_v3, %v977_v57  ;;  %v1020_v8 = vpop.f32.mrb[4].mxu0 }
 0x16c   :  { %v1021_v9 = vpop.f32.mrb[5].mxu0 }
 0x16d   :  { %v1076_v10 = vpop.f32.mrb[4].mxu1  ;;  %v1022_v11 = vadd.f32 %v1021_v9, %v1020_v8  ;;  %v420_v13 = vadd.f32 %v1075_v6, %v315_v7 }
 0x16e   :  { %v1077_v12 = vpop.f32.mrb[5].mxu1 }
 0x16f   :  { %v1078_v14 = vadd.f32 %v1077_v12, %v1076_v10  ;;  %v320_v15 = vadd.f32 %v1022_v11, %v977_v57  ;;  %v1023_v16 = vpop.f32.mrb[6].mxu0 }
 0x170   :  { %v1024_v17 = vpop.f32.mrb[7].mxu0 }
 0x171   :  { %v1079_v18 = vpop.f32.mrb[6].mxu1  ;;  %v1025_v19 = vadd.f32 %v1024_v17, %v1023_v16  ;;  %v425_v21 = vadd.f32 %v1078_v14, %v320_v15  ;;  %v1740_v17 = vmov 0.0|0.0  }
 0x172   :  { %v1080_v20 = vpop.f32.mrb[7].mxu1  ;;  %1490 = vmatprep.subr.bf16.mxu0 %v1740_v17  ;;  %1502 = vmatprep.subr.bf16.mxu1 %v1740_v17 }
 0x173   :  { %v1081_v22 = vadd.f32 %v1080_v20, %v1079_v18  ;;  %v325_v23 = vadd.f32 %v1025_v19, %v977_v57  ;;  %v1026_v24 = vpop.f32.mrb[8].mxu0  ;;  %v1742_v18 = vmov 0.0   ;;  %v769_v19 = vld [vmem:[#allocation10] sm:$0xff]  ;;  %v770_v20 = vld [vmem:[#allocation10 + $0x8] sm:$0xff] }
 0x174   :  { %v1027_v25 = vpop.f32.mrb[9].mxu0  ;;  %1289 = vmatprep.mubr.msk.f32.mxu0 %vm1741_vm0, %v1742_v18 }
 0x175   :  { %v1082_v26 = vpop.f32.mrb[8].mxu1  ;;  %v1028_v27 = vadd.f32 %v1027_v25, %v1026_v24  ;;  %v430_v29 = vadd.f32 %v1081_v22, %v325_v23  ;;  %v1503_v22 = vpack.c.bf16 %v770_v20, %v769_v19  ;;  %v772_v23 = vld [vmem:[#allocation10 + $0x18] sm:$0xff]  ;;  %v773_v25 = vld [vmem:[#allocation10 + $0x20] sm:$0xff] }
 0x176   :  { %v1083_v28 = vpop.f32.mrb[9].mxu1  ;;  %v875_v20 = vld [vmem:[#allocation11 + $0x60] sm:$0xff] }
 0x177   :  { %v1084_v30 = vadd.f32 %v1083_v28, %v1082_v26  ;;  %v330_v31 = vadd.f32 %v1028_v27, %v977_v57  ;;  %v1029_v32 = vpop.f32.mrb[10].mxu0  ;;  %v774_v26 = vld [vmem:[#allocation10 + $0x28] sm:$0xff]  ;;  %v775_v28 = vld [vmem:[#allocation10 + $0x30] sm:$0xff] }
 0x178   :  { %v1030_v33 = vpop.f32.mrb[11].mxu0  ;;  %v1509_v27 = vpack.c.bf16 %v774_v26, %v773_v25  ;;  %v877_v25 = vld [vmem:[#allocation11 + $0x70] sm:$0xff]  ;;  %v878_v26 = vld [vmem:[#allocation11 + $0x78] sm:$0xff] }
 0x179   :  { %v1085_v34 = vpop.f32.mrb[10].mxu1  ;;  %v1031_v35 = vadd.f32 %v1030_v33, %v1029_v32  ;;  %v435_v37 = vadd.f32 %v1084_v30, %v330_v31  ;;  %v777_v31 = vld [vmem:[#allocation10 + $0x40] sm:$0xff]  ;;  %v778_v32 = vld [vmem:[#allocation10 + $0x48] sm:$0xff] }
 0x17a   :  { %v1086_v36 = vpop.f32.mrb[11].mxu1  ;;  %v1515_v33 = vpack.c.bf16 %v778_v32, %v777_v31 }
 0x17b   :  { %v1087_v38 = vadd.f32 %v1086_v36, %v1085_v34  ;;  %v335_v39 = vadd.f32 %v1031_v35, %v977_v57  ;;  %v1032_v40 = vpop.f32.mrb[12].mxu0  ;;  %v779_v34 = vld [vmem:[#allocation10 + $0x50] sm:$0xff]  ;;  %v780_v35 = vld [vmem:[#allocation10 + $0x58] sm:$0xff] }
 0x17c   :  { %v1033_v41 = vpop.f32.mrb[13].mxu0  ;;  %v1518_v36 = vpack.c.bf16 %v780_v35, %v779_v34 }
 0x17d   :  { %v1088_v42 = vpop.f32.mrb[12].mxu1  ;;  %v1034_v43 = vadd.f32 %v1033_v41, %v1032_v40  ;;  %v440_v45 = vadd.f32 %v1087_v38, %v335_v39  ;;  %v782_v38 = vld [vmem:[#allocation10 + $0x68] sm:$0xff]  ;;  %v783_v40 = vld [vmem:[#allocation10 + $0x70] sm:$0xff]  ;;  %v784_v41 = vld [vmem:[#allocation10 + $0x78] sm:$0xff] }
 0x17e   :  { %v1089_v44 = vpop.f32.mrb[13].mxu1 }
 0x17f   :  { %v1090_v46 = vadd.f32 %v1089_v44, %v1088_v42  ;;  %v340_v47 = vadd.f32 %v1034_v43, %v977_v57  ;;  %v1035_v48 = vpop.f32.mrb[14].mxu0  ;;  %v1524_v42 = vpack.c.bf16 %v784_v41, %v783_v40  ;;  %v978_v43 = vld [vmem:[%s1938_s5] ss:$0 sm:$0xff] }
 0x180   :  { %v1036_v49 = vpop.f32.mrb[15].mxu0 }
 0x181   :  { %v1091_v50 = vpop.f32.mrb[14].mxu1  ;;  %v1037_v51 = vadd.f32 %v1036_v49, %v1035_v48  ;;  %v445_v53 = vadd.f32 %v1090_v46, %v340_v47 }
 0x182   :  { %v1092_v52 = vpop.f32.mrb[15].mxu1 }
 0x183   :  { %v1093_v54 = vadd.f32 %v1092_v52, %v1091_v50  ;;  %v345_v55 = vadd.f32 %v1037_v51, %v977_v57  ;;  %v1219_v56 = vpop.f32.mrb[16].mxu0 }
 0x184   :  { %v525_v58 = vadd.f32 %v1219_v56, %v420_v13  ;;  %v519_v59 = vpop.f32.mrb[17].mxu0 }
 0x185   :  { %v520_v60 = vadd.f32 %v519_v59, %v415_v5  ;;  %v450_v61 = vadd.f32 %v1093_v54, %v345_v55 }
 0x186   :  { %v559_v0 = vmax.f32 %v525_v58, 0.0 }
 0x187   :  { %v558_v62 = vmax.f32 %v520_v60, 0.0  ;;  %v1222_v63 = vpop.f32.mrb[18].mxu0 }
 0x188   :  { %v535_v1 = vadd.f32 %v1222_v63, %v430_v29  ;;  %v529_v2 = vpop.f32.mrb[19].mxu0  ;;  %v776_v29 = vld [vmem:[#allocation10 + $0x38] sm:$0xff] }
 0x189   :  { %v530_v3 = vadd.f32 %v529_v2, %v425_v21  ;;  %1261 = vmatprep.mubr.f32.mxu1 %v558_v62  ;;  %v771_v21 = vld [vmem:[#allocation10 + $0x10] sm:$0xff]  ;;  %v1512_v30 = vpack.c.bf16 %v776_v29, %v775_v28  ;;  %v863_v2 = vld [vmem:[#allocation11] sm:$0xff]  ;;  %v980_v28 = vld [vmem:[%s1940_s7] ss:$0 sm:$0xff]  ;;  %s1698_s7 = scalar_lea.vmem %s966_s4, 128 }
 0x18a   :  { %1262 = vmatmul.mubr.f32.vlgmr.msra.gmra.mrb[16].mxu1 %v559_v0  ;;  %v561_v7 = vmax.f32 %v535_v1, 0.0  ;;  %v1506_v24 = vpack.c.bf16 %v772_v23, %v771_v21  ;;  %v694_v1 = vld [vmem:[#allocation5] sm:$0xff]  ;;  %v876_v21 = vld [vmem:[#allocation11 + $0x68] sm:$0xff]  ;;  %p1699_p6 = scmp.ne.s32.totalorder %s966_s4, %s1698_s7  ;;  %p1704_p8 = scmp.lt.s32.totalorder %s1698_s7, %s1698_s7 }
 0x18b   :  { %v560_v4 = vmax.f32 %v530_v3, 0.0  ;;  %v1225_v6 = vpop.f32.mrb[20].mxu0  ;;  %1504 = vmatpush3.bf16.msra.mxu1 %v1503_v22  ;;  %v864_v3 = vld [vmem:[#allocation11 + $0x8] sm:$0xff]  ;;  %v1545_v22 = vpack.c.bf16 %v876_v21, %v875_v20 }
 0x18c   :  { %v545_v8 = vadd.f32 %v1225_v6, %v440_v45  ;;  %v539_v9 = vpop.f32.mrb[21].mxu0  ;;  %1505 = vmatprep.subr.bf16.mxu1 %v1740_v17  ;;  %v1527_v6 = vpack.c.bf16 %v864_v3, %v863_v2  ;;  %p1705_p9 = por %p1704_p8, %p1703_p7 }
 0x18d   :  { %v540_v10 = vadd.f32 %v539_v9, %v435_v37  ;;  %1264 = vmatprep.mubr.f32.mxu1 %v560_v4  ;;  %v781_v37 = vld [vmem:[#allocation10 + $0x60] sm:$0xff]  ;;  %v865_v4 = vld [vmem:[#allocation11 + $0x10] sm:$0xff] }
 0x18e   :  { %1265 = vmatmul.mubr.f32.gmra.mrb[18].mxu1 %v561_v7  ;;  %v563_v5 = vmax.f32 %v545_v8, 0.0  ;;  %v1521_v39 = vpack.c.bf16 %v782_v38, %v781_v37  ;;  %v866_v7 = vld [vmem:[#allocation11 + $0x18] sm:$0xff]  ;;  %v867_v9 = vld [vmem:[#allocation11 + $0x20] sm:$0xff]  ;;  %p1706_p10 = pnand %p1705_p9, %p1699_p6 }
 0x18f   :  { %v562_v57 = vmax.f32 %v540_v10, 0.0  ;;  %v1228_v11 = vpop.f32.mrb[22].mxu0  ;;  %1507 = vmatpush3.bf16.msra.mxu1 %v1506_v24  ;;  %v1530_v8 = vpack.c.bf16 %v866_v7, %v865_v4  ;;  %v868_v10 = vld [vmem:[#allocation11 + $0x28] sm:$0xff] }
 0x190   :  { %v555_v12 = vadd.f32 %v1228_v11, %v450_v61  ;;  %v549_v13 = vpop.f32.mrb[23].mxu0  ;;  %1508 = vmatprep.subr.bf16.mxu1 %v1740_v17  ;;  %v869_v11 = vld [vmem:[#allocation11 + $0x30] sm:$0xff] }
 0x191   :  { %v550_v14 = vadd.f32 %v549_v13, %v445_v53  ;;  %1267 = vmatprep.mubr.f32.mxu1 %v562_v57  ;;  %v1533_v57 = vpack.c.bf16 %v868_v10, %v867_v9  ;;  %v871_v13 = vld [vmem:[#allocation11 + $0x40] sm:$0xff] }
 0x192   :  { %1268 = vmatmul.mubr.f32.gmra.mrb[20].mxu1 %v563_v5  ;;  %v565_v16 = vmax.f32 %v555_v12, 0.0  ;;  %v870_v5 = vld [vmem:[#allocation11 + $0x38] sm:$0xff] }
 0x193   :  { %v564_v15 = vmax.f32 %v550_v14, 0.0  ;;  %1510 = vmatpush3.bf16.msra.mxu1 %v1509_v27  ;;  %v1536_v12 = vpack.c.bf16 %v870_v5, %v869_v11  ;;  %v872_v14 = vld [vmem:[#allocation11 + $0x48] sm:$0xff]  ;;  %v1548_v27 = vpack.c.bf16 %v878_v26, %v877_v25 }
 0x194   :  { %1511 = vmatprep.subr.bf16.mxu1 %v1740_v17 }
 0x195   :  { %1270 = vmatprep.mubr.f32.mxu1 %v564_v15  ;;  %v1539_v15 = vpack.c.bf16 %v872_v14, %v871_v13 }
 0x196   :  { %1271 = vmatmul.mubr.f32.gmra.mrb[22].mxu1 %v565_v16  ;;  %v873_v16 = vld [vmem:[#allocation11 + $0x50] sm:$0xff] }
 0x197   :  { %1324 = vmatprep.mubr.msk.f32.mxu1 %vm1741_vm0, %v1742_v18  ;;  %1513 = vmatpush3.bf16.msra.mxu1 %v1512_v30 }
 0x198   :  { %1514 = vmatprep.subr.bf16.mxu1 %v1740_v17 }
 0x19b   :  { %1516 = vmatpush3.bf16.msra.mxu1 %v1515_v33 }
 0x19c   :  { %1517 = vmatprep.subr.bf16.mxu1 %v1740_v17 }
 0x19f   :  { %1519 = vmatpush3.bf16.msra.mxu1 %v1518_v36 }
 0x1a0   :  { %1520 = vmatprep.subr.bf16.mxu1 %v1740_v17 }
 0x1a3   :  { %1522 = vmatpush3.bf16.msra.mxu1 %v1521_v39 }
 0x1a4   :  { %1523 = vmatprep.subr.bf16.mxu1 %v1740_v17 }
 0x1a7   :  { %1525 = vmatpush3.bf16.msra.mxu1 %v1524_v42 }
 0x25d   :  { %v1263_v44 = vpop.f32.mrb[16].mxu1 }
 0x25e   :  { %v661_v45 = vadd.f32 %v1263_v44, %v978_v43  ;;  %v655_v46 = vpop.f32.mrb[17].mxu1 }
 0x25f   :  { %v656_v47 = vadd.f32 %v978_v43, %v655_v46 }
 0x261   :  { %v1491_v48 = vpack.c.bf16 %v661_v45, %v656_v47  ;;  %v1266_v49 = vpop.f32.mrb[18].mxu1 }
 0x262   :  { %v671_v50 = vadd.f32 %v1266_v49, %v978_v43  ;;  %v665_v51 = vpop.f32.mrb[19].mxu1 }
 0x263   :  { %v666_v52 = vadd.f32 %v978_v43, %v665_v51  ;;  %1492 = vmatpush3.bf16.msra.mxu0 %v1491_v48 }
 0x264   :  { %1493 = vmatprep.subr.bf16.mxu0 %v1740_v17 }
 0x265   :  { %v1494_v53 = vpack.c.bf16 %v671_v50, %v666_v52  ;;  %v1269_v54 = vpop.f32.mrb[20].mxu1 }
 0x266   :  { %v681_v55 = vadd.f32 %v1269_v54, %v978_v43  ;;  %v675_v56 = vpop.f32.mrb[21].mxu1 }
 0x267   :  { %v676_v58 = vadd.f32 %v978_v43, %v675_v56  ;;  %1495 = vmatpush3.bf16.msra.mxu0 %v1494_v53 }
 0x268   :  { %1496 = vmatprep.subr.bf16.mxu0 %v1740_v17 }
 0x269   :  { %v1497_v59 = vpack.c.bf16 %v681_v55, %v676_v58  ;;  %v1272_v60 = vpop.f32.mrb[22].mxu1 }
 0x26a   :  { %v691_v61 = vadd.f32 %v1272_v60, %v978_v43  ;;  %v685_v62 = vpop.f32.mrb[23].mxu1 }
 0x26b   :  { %v686_v63 = vadd.f32 %v978_v43, %v685_v62  ;;  %1498 = vmatpush3.bf16.msra.mxu0 %v1497_v59 }
 0x26c   :  { %1499 = vmatprep.subr.bf16.mxu0 %v1740_v17 }
 0x26d   :  { %v1500_v0 = vpack.c.bf16 %v691_v61, %v686_v63 }
 0x26f   :  { %1501 = vmatpush3.bf16.msra.mxu0 %v1500_v0 }
 0x270   :  { %1526 = vmatprep.subr.bf16.mxu0 %v1740_v17 }
 0x272   :  { %1290 = vmatmul.mubr.msk.f32.vlgmr.msra.gmra.mrb[24].mxu0 %vm695_vm1, %v694_v1 }
 0x273   :  { %1359 = vmatprep.mubr.msk.f32.mxu0 %vm1741_vm0, %v1742_v18  ;;  %1528 = vmatpush3.bf16.msra.mxu0 %v1527_v6  ;;  %v874_v18 = vld [vmem:[#allocation11 + $0x58] sm:$0xff] }
 0x274   :  { %1529 = vmatprep.subr.bf16.mxu0 %v1740_v17  ;;  %v1542_v19 = vpack.c.bf16 %v874_v18, %v873_v16 }
 0x277   :  { %1531 = vmatpush3.bf16.msra.mxu0 %v1530_v8 }
 0x278   :  { %1532 = vmatprep.subr.bf16.mxu0 %v1740_v17 }
 0x27b   :  { %1534 = vmatpush3.bf16.msra.mxu0 %v1533_v57 }
 0x27c   :  { %1535 = vmatprep.subr.bf16.mxu0 %v1740_v17 }
 0x27f   :  { %1537 = vmatpush3.bf16.msra.mxu0 %v1536_v12 }
 0x280   :  { %1538 = vmatprep.subr.bf16.mxu0 %v1740_v17 }
 0x283   :  { %1540 = vmatpush3.bf16.msra.mxu0 %v1539_v15 }
 0x284   :  { %1541 = vmatprep.subr.bf16.mxu0 %v1740_v17 }
 0x287   :  { %1543 = vmatpush3.bf16.msra.mxu0 %v1542_v19 }
 0x288   :  { %1544 = vmatprep.subr.bf16.mxu0 %v1740_v17 }
 0x28b   :  { %1546 = vmatpush3.bf16.msra.mxu0 %v1545_v22 }
 0x28c   :  { %1547 = vmatprep.subr.bf16.mxu0 %v1740_v17  ;;  %v981_v17 = vld [vmem:[%s1942_s9] ss:$0 sm:$0xff] }
 0x28f   :  { %1549 = vmatpush3.bf16.msra.mxu0 %v1548_v27 }
 0x345   :  { %v765_v23 = vpop.f32.mrb[24].mxu0 }
 0x346   :  { %v1291_v24 = vpop.f32.mrb[25].mxu0  ;;  %1325 = vmatmul.mubr.f32.vlgmr.msra.gmra.mrb[24].mxu1 %v765_v23 }
 0x419   :  { %v858_v29 = vpop.f32.mrb[24].mxu1 }
 0x41a   :  { %v859_v30 = vadd.f32 %v980_v28, %v858_v29  ;;  %v1326_v31 = vpop.f32.mrb[25].mxu1 }
 0x41c   :  { %v862_v32 = vmax.f32 %v859_v30, 0.0 }
 0x41e   :  { %1360 = vmatmul.mubr.f32.vlgmr.msra.gmra.mrb[26].mxu0 %v862_v32 }
 0x4f1   :  { %v952_v33 = vpop.f32.mrb[26].mxu0 }
 0x4f2   :  { %v953_v34 = vadd.f32 %v981_v17, %v952_v33  ;;  %v1361_v35 = vpop.f32.mrb[27].mxu0 }
 0x4f4   :  { %1564 = vtanh.f32 %v953_v34 }
 0x4fe   :  { %v1565_v36 = vpop.eup %1564 }
 0x4ff   :  { %v957_v37 = vmul.f32 8.0, %v1565_v36 }
 0x501   :  { %958 = vst [vmem:[#allocation13] sm:$0xff] %v957_v37 }
 0x502   :  { %1709 = shalt.err (!%p1706_p10)
}
 0x503   :  { %s1710_s9 = scalar_lea.hbm %s1943_s10, 128 }
 0x504   :  { %p1711_p11 = scmp.ne.s32.totalorder %s1943_s10, %s1710_s9  ;;  %p1714_p12 = scmp.lt.u32.totalorder %s1710_s9, %s1943_s10 }
 0x506   :  { %p1716_p13 = pnand %p1714_p12, %p1711_p11 }
 0x508   :  { %1719 = shalt.err (!%p1716_p13)
}
 0x509   :  { %968 = dma.vmem_to_hbm [thread:$0]  %s966_s4, 128, %s1943_s10, [#allocation4]  }
 0x50a   :  { %1728 = dma.done.wait [#allocation4], 128  }
 0x50b   :  { %1729 = vsyncadd [#allocation4], 4294967168 }
 0x50c   :  { %972 = vsyncpa [#allocation3], 1 }
 0x50d   :  { %973 = vsyncpa [#allocation6], 1 }
 0x50e   :  { %974 = vsyncpa [#allocation9], 1 }
 0x50f   :  { %975 = vsyncpa [#allocation12], 1 }
 0x510   :  { %976 = vsyncpa [#allocation4], 1 }

</bundles_post_ra>
